<compile_context>
chip_gen: v6e
topology: v6e:2x2x1
jax: 0.10.0
libtpu: 0.0.40
codegen_flags: <defaults>
</compile_context>

<pallas_src>
import jax
import jax.numpy as jnp
from jax.experimental import pallas as pl
from jax.experimental.pallas import tpu as pltpu


def _normformer_kernel(scale_ref, seqs_ref, res_ref, out_ref):
    """out = seqs + scale * residual on one (TR, M) row tile.

    scale_ref : VMEM (1, M)  per-feature scale, already in the input dtype
    seqs_ref  : VMEM (TR, M)
    res_ref   : VMEM (TR, M)
    out_ref   : VMEM (TR, M)
    """
    scale = scale_ref[...]                                   # (1, M), input dtype
    out_ref[...] = (seqs_ref[...] + scale * res_ref[...]).astype(out_ref.dtype)


def _choose_row_tile(rows: int, row_bytes: int) -> int:
    """Pick a row tile so one block is ~4 MiB (or the full array if smaller)."""
    target = 4 * 1024 * 1024
    tr = max(8, target // max(1, row_bytes))
    tr -= tr % 8                       # (8, 128) sublane divisibility rule
    tr = max(8, tr)
    if rows <= tr:
        return rows                    # block == full extent: always legal
    return tr


def normformer_residual_connect(
    seqs: jax.Array,
    residual: jax.Array,
    scale_proj: jax.Array,
    *,
    row_tile: int | None = None,
) -> jax.Array:
    """Pallas implementation of NormFormerResidualConnect.forward."""
    assert seqs.shape == residual.shape
    assert seqs.dtype == residual.dtype
    n, s, m = seqs.shape
    assert scale_proj.shape == (m,)

    rows = n * s
    x = seqs.reshape(rows, m)
    r = residual.reshape(rows, m)
    scale = scale_proj.astype(seqs.dtype)     # keep all math in the input dtype

    # Lane-dense folding for small model dims: present the data as a
    # (rows * m / 128, 128) slab so output stores are unmasked full-lane vst.
    if m < 128 and 128 % m == 0 and (rows * m) % 128 == 0:
        fold = 128 // m
        m2 = 128
        rows2 = (rows * m) // 128
        x = x.reshape(rows2, m2)
        r = r.reshape(rows2, m2)
        scale2d = jnp.tile(scale, fold).reshape(1, m2)
    else:
        rows2, m2 = rows, m
        scale2d = scale.reshape(1, m)

    itemsize = jnp.dtype(seqs.dtype).itemsize
    tr = row_tile if row_tile is not None else _choose_row_tile(rows2, m2 * itemsize)
    grid = (pl.cdiv(rows2, tr),)              # ragged last tile is masked by Pallas

    out = pl.pallas_call(
        _normformer_kernel,
        out_shape=jax.ShapeDtypeStruct((rows2, m2), seqs.dtype),
        grid_spec=pltpu.PrefetchScalarGridSpec(
            num_scalar_prefetch=0,
            grid=grid,
            in_specs=[
                pl.BlockSpec((1, m2), lambda i: (0, 0)),    # scale: resident in VMEM
                pl.BlockSpec((tr, m2), lambda i: (i, 0)),   # seqs
                pl.BlockSpec((tr, m2), lambda i: (i, 0)),   # residual
            ],
            out_specs=pl.BlockSpec((tr, m2), lambda i: (i, 0)),
        ),
        compiler_params=pltpu.CompilerParams(
            # Fully parallel grid: lets megacore (v7x 2 TCs) split the row tiles.
            dimension_semantics=("parallel",),
            # ~24 MiB of double-buffered blocks + headroom; safe on v7x's 64 MiB.
            vmem_limit_bytes=48 * 1024 * 1024,
        ),
    )(scale2d, x, r)

    return out.reshape(n, s, m)


if __name__ == "__main__":
    root = jax.random.PRNGKey(0)
    k1, k2, k3, k4, k5, k6 = jax.random.split(root, 6)

    # Primary small test consistent with (N, S, M): batch=2, seq=8, hidden=32.
    # M=32 < 128 exercises the lane-dense folding path.
    N, S, M = 2, 8, 32
    seqs = jax.random.normal(k1, (N, S, M), dtype=jnp.float32)
    residual = jax.random.normal(k2, (N, S, M), dtype=jnp.float32)
    scale = jax.random.normal(k3, (M,), dtype=jnp.float32)

    out = jax.block_until_ready(normformer_residual_connect(seqs, residual, scale))
    ref = seqs + scale[None, None, :] * residual
    assert out.shape == seqs.shape and out.dtype == seqs.dtype
    assert jnp.allclose(out, ref, atol=1e-6, rtol=1e-6)

    # Multi-step grid with a ragged last tile: rows = 3*5 = 15, row_tile = 8.
    seqs2 = jax.random.normal(k4, (3, 5, 128), dtype=jnp.float32)
    res2 = jax.random.normal(k5, (3, 5, 128), dtype=jnp.float32)
    scale2 = jax.random.normal(k6, (128,), dtype=jnp.float32)
    out2 = jax.block_until_ready(
        normformer_residual_connect(seqs2, res2, scale2, row_tile=8)
    )
    ref2 = seqs2 + scale2[None, None, :] * res2
    assert jnp.allclose(out2, ref2, atol=1e-6, rtol=1e-6)

    # bf16 inputs: math stays in bf16 in-kernel (no f32 promotion / store mismatch).
    seqs3 = seqs.astype(jnp.bfloat16)
    res3 = residual.astype(jnp.bfloat16)
    scale3 = scale.astype(jnp.bfloat16)
    out3 = jax.block_until_ready(normformer_residual_connect(seqs3, res3, scale3))
    ref3 = (
        seqs3.astype(jnp.float32)
        + scale3.astype(jnp.float32)[None, None, :] * res3.astype(jnp.float32)
    )
    assert out3.dtype == jnp.bfloat16
    assert jnp.allclose(out3.astype(jnp.float32), ref3, atol=5e-2, rtol=5e-2)

    print("KERNEL_OK")
</pallas_src>

<mosaic_0001>
module attributes {stable_mosaic.version = 11 : i64} {
  func.func @_normformer_kernel(%arg0: i32, %arg1: memref<1x128xf32, #tpu.memory_space<vmem>>, %arg2: memref<4x128xf32, #tpu.memory_space<vmem>>, %arg3: memref<4x128xf32, #tpu.memory_space<vmem>>, %arg4: memref<4x128xf32, #tpu.memory_space<vmem>>) attributes {dimension_semantics = [#tpu.dimension_semantics<parallel>], iteration_bounds = array<i64: 1>, scalar_prefetch = 0 : i64, scratch_operands = 0 : i64, tpu.core_type = #tpu.core_type<tc>, window_params = [{pipeline_mode = #tpu.pipeline_mode<synchronous>, transform_indices = @transform_0, window_bounds = array<i64: 1, 128>}, {transform_indices = @transform_1, window_bounds = array<i64: 4, 128>}, {transform_indices = @transform_2, window_bounds = array<i64: 4, 128>}, {transform_indices = @transform_3, window_bounds = array<i64: 4, 128>}]} {
    %c0 = arith.constant 0 : index
    %c0_0 = arith.constant 0 : index
    %0 = vector.load %arg1[%c0, %c0_0] : memref<1x128xf32, #tpu.memory_space<vmem>>, vector<1x128xf32>
    %c0_1 = arith.constant 0 : index
    %c0_2 = arith.constant 0 : index
    %1 = vector.load %arg2[%c0_1, %c0_2] : memref<4x128xf32, #tpu.memory_space<vmem>>, vector<4x128xf32>
    %c0_3 = arith.constant 0 : index
    %c0_4 = arith.constant 0 : index
    %2 = vector.load %arg3[%c0_3, %c0_4] : memref<4x128xf32, #tpu.memory_space<vmem>>, vector<4x128xf32>
    %3 = vector.broadcast %0 : vector<1x128xf32> to vector<4x128xf32>
    %4 = arith.mulf %3, %2 : vector<4x128xf32>
    %5 = arith.addf %1, %4 : vector<4x128xf32>
    %c0_5 = arith.constant 0 : index
    %c0_6 = arith.constant 0 : index
    %6 = vector.load %arg4[%c0_5, %c0_6] : memref<4x128xf32, #tpu.memory_space<vmem>>, vector<4x128xf32>
    tpu.vector_store %arg4[%c0_5, %c0_6], %5 {strides = array<i32>} : memref<4x128xf32, #tpu.memory_space<vmem>>, vector<4x128xf32>,
    return
  }
  func.func @transform_0(%arg0: i32) -> (i32, i32) {
    %c0_i32 = arith.constant 0 : i32
    %c0_i32_0 = arith.constant 0 : i32
    %c0_i32_1 = arith.constant 0 : i32
    return %c0_i32, %c0_i32_0 : i32, i32
  }
  func.func @transform_1(%arg0: i32) -> (i32, i32) {
    %c0_i32 = arith.constant 0 : i32
    %c0_i32_0 = arith.constant 0 : i32
    return %arg0, %c0_i32 : i32, i32
  }
  func.func @transform_2(%arg0: i32) -> (i32, i32) {
    %c0_i32 = arith.constant 0 : i32
    %c0_i32_0 = arith.constant 0 : i32
    return %arg0, %c0_i32 : i32, i32
  }
  func.func @transform_3(%arg0: i32) -> (i32, i32) {
    %c0_i32 = arith.constant 0 : i32
    %c0_i32_0 = arith.constant 0 : i32
    return %arg0, %c0_i32 : i32, i32
  }
}

</mosaic_0001>

<bundles_post_ra>
// kernel: tpu_custom_call.1
= control target key start
LH: loop header
LB: loop body
LE: loop exit
PB: predicated region body
PF: predicated region fallthrough
CT: control target
= control target key end

     0   :  { %8 = vsyncpa [#allocation3], 0  ;;  %s205_s0 = inlined_call_operand.hbm [shape: f32[1,128], index: 0, kind: input, shape index: {}]   ;;  %s206_s1 = inlined_call_operand.hbm [shape: f32[4,128], index: 1, kind: input, shape index: {}]   ;;  %s207_s2 = inlined_call_operand.hbm [shape: f32[4,128], index: 2, kind: input, shape index: {}]   ;;  %s208_s3 = inlined_call_operand.hbm [shape: f32[4,128], index: 3, kind: output, shape index: {}]  }
   0x1   :  { %9 = vsyncpa [#allocation6], 0 }
   0x2   :  { %10 = vsyncpa [#allocation4], 0  ;;  %s169_s12 = smov [#allocation5]   ;;  %s170_s14 = smov [#allocation2]  }
   0x3   :  { %s27_s13 = sshll.u32 %s169_s12, 4  ;;  %s17_s15 = sshll.u32 %s170_s14, 4  ;;  %s28_s13 = int_to_ptr.vmem [resolvable:$true] %s27_s13  ;;  %s18_s15 = int_to_ptr.vmem [resolvable:$true] %s17_s15 }
   0x4   :  { %s91_s16 = scalar_lea.vmem %s28_s13, 64  ;;  %p96_p1 = scmp.lt.s32.totalorder %s28_s13, %s28_s13 }
   0x5   :  { %p92_p0 = scmp.ne.s32.totalorder %s28_s13, %s91_s16  ;;  %p97_p2 = scmp.lt.s32.totalorder %s91_s16, %s91_s16 }
   0x7   :  { %p98_p3 = por %p97_p2, %p96_p1 }
   0x9   :  { %p99_p4 = pnand %p98_p3, %p92_p0 }
   0xb   :  { %102 = shalt.err (!%p99_p4)
}
   0xc   :  { %30 = dma.hbm_to_vmem [thread:$0]  %s206_s1, 64, %s28_s13, [#allocation6]  }
   0xd   :  { %s111_s19 = scalar_lea.vmem %s18_s15, 16  ;;  %s115_s20 = scalar_lea.vmem %s18_s15, 32 }
   0xe   :  { %p112_p5 = scmp.ne.s32.totalorder %s18_s15, %s111_s19  ;;  %p116_p6 = scmp.lt.s32.totalorder %s18_s15, %s18_s15 }
   0xf   :  { %p117_p7 = scmp.lt.s32.totalorder %s115_s20, %s111_s19 }
  0x11   :  { %p118_p8 = por %p117_p7, %p116_p6 }
  0x13   :  { %p119_p9 = pnand %p118_p8, %p112_p5 }
  0x15   :  { %122 = shalt.err (!%p119_p9)
}
  0x16   :  { %20 = dma.hbm_to_vmem [thread:$0]  %s205_s0, 16, %s18_s15, [#allocation3]  }
  0x17   :  { %s171_s23 = smov [#allocation7]  }
  0x18   :  { %s37_s24 = sshll.u32 %s171_s23, 4  ;;  %s38_s24 = int_to_ptr.vmem [resolvable:$true] %s37_s24 }
  0x19   :  { %s131_s25 = scalar_lea.vmem %s38_s24, 64  ;;  %p136_p11 = scmp.lt.s32.totalorder %s38_s24, %s38_s24 }
  0x1a   :  { %p132_p10 = scmp.ne.s32.totalorder %s38_s24, %s131_s25  ;;  %p137_p12 = scmp.lt.s32.totalorder %s131_s25, %s131_s25 }
  0x1c   :  { %p138_p13 = por %p137_p12, %p136_p11 }
  0x1e   :  { %p139_p0 = pnand %p138_p13, %p132_p10 }
  0x20   :  { %142 = shalt.err (!%p139_p0)
}
  0x21   :  { %40 = dma.hbm_to_vmem [thread:$0]  %s207_s2, 64, %s38_s24, [#allocation6]  }
  0x22   :  { %163 = dma.done.wait [#allocation3], 16  }
  0x23   :  { %164 = vsyncadd [#allocation3], 4294967280 }
  0x24   :  { %165 = dma.done.wait [#allocation6], 128  }
  0x25   :  { %166 = vsyncadd [#allocation6], 4294967168  ;;  %s172_s27 = smov [#allocation8]   ;;  %v78_v0 = vld [vmem:[#allocation2] ss:$0 sm:$0xff] }
  0x26   :  { %s68_s0 = sshll.u32 %s172_s27, 4  ;;  %v51_v1 = vld [vmem:[#allocation5] sm:$0xf]  ;;  %v52_v2 = vld [vmem:[#allocation7] sm:$0xf]  ;;  %s69_s0 = int_to_ptr.vmem [resolvable:$true] %s68_s0 }
  0x27   :  { %v59_v3 = vmul.f32 %v78_v0, %v52_v2  ;;  %s143_s28 = scalar_lea.vmem %s69_s0, 64  ;;  %p148_p2 = scmp.lt.s32.totalorder %s69_s0, %s69_s0 }
  0x28   :  { %p144_p1 = scmp.ne.s32.totalorder %s69_s0, %s143_s28  ;;  %p149_p3 = scmp.lt.s32.totalorder %s143_s28, %s143_s28 }
  0x29   :  { %v60_v4 = vadd.f32 %v59_v3, %v51_v1 }
  0x2a   :  { %p150_p4 = por %p149_p3, %p148_p2 }
  0x2b   :  { %61 = vst [vmem:[#allocation8] sm:$0xf] %v60_v4 }
  0x2c   :  { %p151_p5 = pnand %p150_p4, %p144_p1 }
  0x2e   :  { %154 = shalt.err (!%p151_p5)
}
  0x2f   :  { %71 = dma.vmem_to_hbm [thread:$0]  %s69_s0, 64, %s208_s3, [#allocation4]  }
  0x30   :  { %167 = dma.done.wait [#allocation4], 64  }
  0x31   :  { %168 = vsyncadd [#allocation4], 4294967232 }
  0x32   :  { %75 = vsyncpa [#allocation3], 1 }
  0x33   :  { %76 = vsyncpa [#allocation6], 1 }
  0x34   :  { %77 = vsyncpa [#allocation4], 1 }

</bundles_post_ra>
